<compile_context>
chip_gen: v7x
topology: tpu7x:2x2x1
jax: 0.10.0
libtpu: 0.0.40
codegen_flags: <defaults>
</compile_context>

<pallas_src>
import functools

import jax
import jax.numpy as jnp
from jax import lax
from jax.experimental import pallas as pl
from jax.experimental.pallas import tpu as pltpu


def _cdiv(a, b):
    return -(-a // b)


def _round_up(x, m):
    return ((x + m - 1) // m) * m


def _inter_cell_loss_kernel(*refs, tm, tn, n_valid, mask_rows, mask_cols,
                            has_hn):
    if has_hn:
        xi_ref, xj_ref, hu_ref, hn_ref, out_ref, acc_u_ref, acc_x_ref = refs
    else:
        xi_ref, xj_ref, hu_ref, out_ref, acc_u_ref, acc_x_ref = refs
        hn_ref = None

    j = pl.program_id(1)
    nj = pl.num_programs(1)

    @pl.when(j == 0)
    def _init():
        acc_u_ref[...] = jnp.zeros_like(acc_u_ref)
        acc_x_ref[...] = jnp.zeros_like(acc_x_ref)

    # xi rows already carry the 1/tau scale; both sides are pre-normalized f32.
    xi = xi_ref[...]                               # (tm, D)
    xj = xj_ref[...]                               # (tn, D)

    # Contract the last (feature) dim of both operands -> no explicit transpose.
    s = lax.dot_general(xi, xj,
                        dimension_numbers=(((1,), (1,)), ((), ())),
                        preferred_element_type=jnp.float32)       # (tm, tn)
    e = jnp.exp(s)

    # Validity mask for ragged edge tiles (only generated when needed).
    valid = None
    if mask_rows:
        rows = pl.program_id(0) * tm + lax.broadcasted_iota(
            jnp.int32, (tm, tn), 0)
        valid = rows < n_valid
    if mask_cols:
        cols = j * tn + lax.broadcasted_iota(jnp.int32, (tm, tn), 1)
        cvalid = cols < n_valid
        valid = cvalid if valid is None else (valid & cvalid)

    hu = hu_ref[...].astype(jnp.float32)
    if valid is not None:
        hu = jnp.where(valid, hu, 0.0)
    acc_u_ref[...] += hu * e                       # pure VPU accumulate

    if has_hn:
        hn = hn_ref[...].astype(jnp.float32)
        if valid is not None:
            hn = jnp.where(valid, hn, 0.0)
        acc_x_ref[...] += hn * e
    else:
        ev = e if valid is None else jnp.where(valid, e, 0.0)
        acc_x_ref[...] += ev                       # complement path: sum(e)

    @pl.when(j == nj - 1)
    def _finalize():
        # Single cross-lane reduce per i-block, emitted lane-dense.
        su = jnp.sum(acc_u_ref[...])
        sx = jnp.sum(acc_x_ref[...])
        lane = lax.broadcasted_iota(jnp.int32, (1, 8, 128), 2)
        out_ref[...] = jnp.where(lane == 0, su, jnp.where(lane == 1, sx, 0.0))


def inter_cell_loss(x_ach, H_union, H_none, tau, *, block_m=512, block_n=1024):
    """Scalar float32 loss matching the PyTorch module's forward.

    H_union / H_none may be float, int8/uint8 or bool. If the caller
    guarantees H_none == 1 - H_union, pass H_none=None to halve mask traffic.
    """
    N, D = x_ach.shape
    assert H_union.shape == (N, N)
    has_hn = H_none is not None
    if has_hn:
        assert H_none.shape == (N, N)

    # ---- O(N*D) JAX pre-pass: normalize rows, fold 1/tau into the i side. ---
    x32 = x_ach.astype(jnp.float32)
    # F.normalize: x / max(||x||, 1e-12) == x * rsqrt(max(||x||^2, 1e-24)).
    inv = lax.rsqrt(jnp.maximum(jnp.sum(x32 * x32, axis=-1, keepdims=True),
                                1e-24))
    xn = x32 * inv
    xi_arr = xn * (1.0 / float(tau))
    xj_arr = xn

    if H_union.dtype == jnp.bool_:
        H_union = H_union.astype(jnp.int8)
    if has_hn and H_none.dtype == jnp.bool_:
        H_none = H_none.astype(jnp.int8)

    # ---- Tile sizes. tm clamped so num_i >= 2 whenever possible (v7x). -----
    bm = _round_up(block_m, 8)
    bn = _round_up(block_n, 128)
    tm = min(bm, _round_up(_cdiv(N, 2), 8))
    if tm >= N:
        tm = N
    tn = bn if N >= bn else N                       # == full dim when smaller

    num_i = _cdiv(N, tm)
    num_j = _cdiv(N, tn)
    Nm = num_i * tm
    Nn = num_j * tn

    # Only x (O(N*D)) is padded; the N^2 masks are never copied -- edge tiles
    # are masked in-kernel instead.
    if Nm != N:
        xi_arr = jnp.pad(xi_arr, ((0, Nm - N), (0, 0)))
    if Nn != N:
        xj_arr = jnp.pad(xj_arr, ((0, Nn - N), (0, 0)))
    mask_rows = Nm != N
    mask_cols = Nn != N

    kernel = functools.partial(
        _inter_cell_loss_kernel,
        tm=tm, tn=tn, n_valid=N,
        mask_rows=mask_rows, mask_cols=mask_cols, has_hn=has_hn)

    in_specs = [
        pl.BlockSpec((tm, D), lambda i, j: (i, 0)),      # x rows, i side
        pl.BlockSpec((tn, D), lambda i, j: (j, 0)),      # x rows, j side
        pl.BlockSpec((tm, tn), lambda i, j: (i, j)),     # H_union tile
    ]
    inputs = [xi_arr, xj_arr, H_union]
    if has_hn:
        in_specs.append(pl.BlockSpec((tm, tn), lambda i, j: (i, j)))
        inputs.append(H_none)

    partials = pl.pallas_call(
        kernel,
        out_shape=jax.ShapeDtypeStruct((num_i, 8, 128), jnp.float32),
        grid_spec=pltpu.PrefetchScalarGridSpec(
            num_scalar_prefetch=0,
            grid=(num_i, num_j),                          # reduction axis last
            in_specs=in_specs,
            out_specs=pl.BlockSpec((1, 8, 128), lambda i, j: (i, 0, 0)),
            scratch_shapes=[pltpu.VMEM((tm, tn), jnp.float32),
                            pltpu.VMEM((tm, tn), jnp.float32)],
        ),
        compiler_params=pltpu.CompilerParams(
            dimension_semantics=("parallel", "arbitrary"),
            vmem_limit_bytes=48 * 1024 * 1024),
    )(*inputs)

    neighbor_sum = jnp.sum(partials[:, 0, 0])
    second_sum = jnp.sum(partials[:, 0, 1])
    none_neighbor_sum = second_sum if has_hn else second_sum - neighbor_sum
    # -log(a / b) == log(b) - log(a)
    return jnp.log(none_neighbor_sum) - jnp.log(neighbor_sum)


def _reference(x_ach, H_union, H_none, tau):
    norm = jnp.maximum(jnp.linalg.norm(x_ach, axis=1, keepdims=True), 1e-12)
    xn = x_ach / norm
    sim_mat = jnp.exp((xn @ xn.T) / tau)
    return -jnp.log(jnp.sum(H_union * sim_mat) / jnp.sum(H_none * sim_mat))


if __name__ == "__main__":
    key = jax.random.PRNGKey(0)
    tau = 0.5
    k1, k2, k3, k4, k5, k6 = jax.random.split(key, 6)

    # Case 1: N divides the chosen tiles, f32 masks, explicit H_none.
    N, D = 256, 32
    x = jax.random.normal(k1, (N, D), dtype=jnp.float32)
    hu_bits = jax.random.bernoulli(k2, p=0.3, shape=(N, N))
    Hu = hu_bits.astype(jnp.float32)
    Hn = (~hu_bits).astype(jnp.float32)
    loss = jax.block_until_ready(inter_cell_loss(x, Hu, Hn, tau))
    ref = _reference(x, Hu, Hn, tau)
    assert jnp.allclose(loss, ref, atol=1e-3, rtol=1e-3), (loss, ref)

    # Case 2: ragged N, int8 mask, complement path (H_none == 1 - H_union).
    N2 = 70
    x2 = jax.random.normal(k3, (N2, D), dtype=jnp.float32)
    hu2 = jax.random.bernoulli(k4, p=0.3, shape=(N2, N2))
    loss2 = jax.block_until_ready(
        inter_cell_loss(x2, hu2.astype(jnp.int8), None, tau))
    ref2 = _reference(x2, hu2.astype(jnp.float32),
                      (~hu2).astype(jnp.float32), tau)
    assert jnp.allclose(loss2, ref2, atol=1e-3, rtol=1e-3), (loss2, ref2)

    # Case 3: ragged N with small tiles -> row + col edge masking over a
    # multi-tile grid, int8 masks, explicit H_none.
    N3 = 200
    x3 = jax.random.normal(k5, (N3, D), dtype=jnp.float32)
    hu3 = jax.random.bernoulli(k6, p=0.3, shape=(N3, N3))
    loss3 = jax.block_until_ready(
        inter_cell_loss(x3, hu3.astype(jnp.int8), (~hu3).astype(jnp.int8), tau,
                        block_m=64, block_n=128))
    ref3 = _reference(x3, hu3.astype(jnp.float32),
                      (~hu3).astype(jnp.float32), tau)
    assert jnp.allclose(loss3, ref3, atol=1e-3, rtol=1e-3), (loss3, ref3)

    print("KERNEL_OK")
</pallas_src>

<mosaic_0001>
module attributes {stable_mosaic.version = 11 : i64} {
  func.func @_inter_cell_loss_kernel(%arg0: i32, %arg1: i32, %arg2: memref<128x32xf32, #tpu.memory_space<vmem>>, %arg3: memref<256x32xf32, #tpu.memory_space<vmem>>, %arg4: memref<128x256xf32, #tpu.memory_space<vmem>>, %arg5: memref<128x256xf32, #tpu.memory_space<vmem>>, %arg6: memref<1x8x128xf32, #tpu.memory_space<vmem>>, %arg7: memref<128x256xf32, #tpu.memory_space<vmem>>, %arg8: memref<128x256xf32, #tpu.memory_space<vmem>>) attributes {dimension_semantics = [#tpu.dimension_semantics<parallel>, #tpu.dimension_semantics<arbitrary>], iteration_bounds = array<i64: 2, 1>, scalar_prefetch = 0 : i64, scratch_operands = 2 : i64, tpu.core_type = #tpu.core_type<tc>, window_params = [{transform_indices = @transform_0, window_bounds = array<i64: 128, 32>}, {transform_indices = @transform_1, window_bounds = array<i64: 256, 32>}, {transform_indices = @transform_2, window_bounds = array<i64: 128, 256>}, {transform_indices = @transform_3, window_bounds = array<i64: 128, 256>}, {transform_indices = @transform_4, window_bounds = array<i64: 1, 8, 128>}]} {
    %c0_i32 = arith.constant 0 : i32
    %0 = arith.cmpi eq, %arg1, %c0_i32 : i32
    %1 = arith.extui %0 : i1 to i32
    %c0_i32_0 = arith.constant 0 : i32
    %2 = arith.cmpi ne, %1, %c0_i32_0 : i32
    scf.if %2 {
      %cst_18 = arith.constant 0.000000e+00 : f32
      %20 = vector.broadcast %cst_18 : f32 to vector<128x256xf32>
      %c0_19 = arith.constant 0 : index
      %c0_20 = arith.constant 0 : index
      %21 = vector.load %arg7[%c0_19, %c0_20] : memref<128x256xf32, #tpu.memory_space<vmem>>, vector<128x256xf32>
      tpu.vector_store %arg7[%c0_19, %c0_20], %20 {strides = array<i32>} : memref<128x256xf32, #tpu.memory_space<vmem>>, vector<128x256xf32>,
      %cst_21 = arith.constant 0.000000e+00 : f32
      %22 = vector.broadcast %cst_21 : f32 to vector<128x256xf32>
      %c0_22 = arith.constant 0 : index
      %c0_23 = arith.constant 0 : index
      %23 = vector.load %arg8[%c0_22, %c0_23] : memref<128x256xf32, #tpu.memory_space<vmem>>, vector<128x256xf32>
      tpu.vector_store %arg8[%c0_22, %c0_23], %22 {strides = array<i32>} : memref<128x256xf32, #tpu.memory_space<vmem>>, vector<128x256xf32>,
    } else {
    }
    %c0 = arith.constant 0 : index
    %c0_1 = arith.constant 0 : index
    %3 = vector.load %arg2[%c0, %c0_1] : memref<128x32xf32, #tpu.memory_space<vmem>>, vector<128x32xf32>
    %c0_2 = arith.constant 0 : index
    %c0_3 = arith.constant 0 : index
    %4 = vector.load %arg3[%c0_2, %c0_3] : memref<256x32xf32, #tpu.memory_space<vmem>>, vector<256x32xf32>
    %cst = arith.constant dense<0.000000e+00> : vector<128x256xf32>
    %5 = tpu.matmul %3, %4, %cst {dimension_numbers = #tpu.dot_dimension_numbers<[1], [1], [0], [0], [0, 0, 1, 0], [], []>} : vector<128x32xf32>, vector<256x32xf32>, vector<128x256xf32> -> vector<128x256xf32>
    %6 = math.exp %5 : vector<128x256xf32>
    %c0_4 = arith.constant 0 : index
    %c0_5 = arith.constant 0 : index
    %7 = vector.load %arg4[%c0_4, %c0_5] : memref<128x256xf32, #tpu.memory_space<vmem>>, vector<128x256xf32>
    %c0_6 = arith.constant 0 : index
    %c0_7 = arith.constant 0 : index
    %8 = vector.load %arg7[%c0_6, %c0_7] : memref<128x256xf32, #tpu.memory_space<vmem>>, vector<128x256xf32>
    %9 = arith.mulf %7, %6 : vector<128x256xf32>
    %10 = arith.addf %8, %9 : vector<128x256xf32>
    %c0_8 = arith.constant 0 : index
    %c0_9 = arith.constant 0 : index
    %11 = vector.load %arg7[%c0_8, %c0_9] : memref<128x256xf32, #tpu.memory_space<vmem>>, vector<128x256xf32>
    tpu.vector_store %arg7[%c0_8, %c0_9], %10 {strides = array<i32>} : memref<128x256xf32, #tpu.memory_space<vmem>>, vector<128x256xf32>,
    %c0_10 = arith.constant 0 : index
    %c0_11 = arith.constant 0 : index
    %12 = vector.load %arg5[%c0_10, %c0_11] : memref<128x256xf32, #tpu.memory_space<vmem>>, vector<128x256xf32>
    %c0_12 = arith.constant 0 : index
    %c0_13 = arith.constant 0 : index
    %13 = vector.load %arg8[%c0_12, %c0_13] : memref<128x256xf32, #tpu.memory_space<vmem>>, vector<128x256xf32>
    %14 = arith.mulf %12, %6 : vector<128x256xf32>
    %15 = arith.addf %13, %14 : vector<128x256xf32>
    %c0_14 = arith.constant 0 : index
    %c0_15 = arith.constant 0 : index
    %16 = vector.load %arg8[%c0_14, %c0_15] : memref<128x256xf32, #tpu.memory_space<vmem>>, vector<128x256xf32>
    tpu.vector_store %arg8[%c0_14, %c0_15], %15 {strides = array<i32>} : memref<128x256xf32, #tpu.memory_space<vmem>>, vector<128x256xf32>,
    %c0_i32_16 = arith.constant 0 : i32
    %17 = arith.cmpi eq, %arg1, %c0_i32_16 : i32
    %18 = arith.extui %17 : i1 to i32
    %c0_i32_17 = arith.constant 0 : i32
    %19 = arith.cmpi ne, %18, %c0_i32_17 : i32
    scf.if %19 {
      %c0_18 = arith.constant 0 : index
      %c0_19 = arith.constant 0 : index
      %20 = vector.load %arg7[%c0_18, %c0_19] : memref<128x256xf32, #tpu.memory_space<vmem>>, vector<128x256xf32>
      %21 = vector.shape_cast %20 : vector<128x256xf32> to vector<1x128x256xf32>
      %cst_20 = arith.constant dense<0.000000e+00> : vector<1xf32>
      %22 = vector.multi_reduction <add>, %21, %cst_20 [1, 2] : vector<1x128x256xf32> to vector<1xf32>
      %23 = vector.shape_cast %22 : vector<1xf32> to vector<1x1x1xf32>
      %24 = vector.extract %23[0, 0, 0] : f32 from vector<1x1x1xf32>
      %c0_21 = arith.constant 0 : index
      %c0_22 = arith.constant 0 : index
      %25 = vector.load %arg8[%c0_21, %c0_22] : memref<128x256xf32, #tpu.memory_space<vmem>>, vector<128x256xf32>
      %26 = vector.shape_cast %25 : vector<128x256xf32> to vector<1x128x256xf32>
      %cst_23 = arith.constant dense<0.000000e+00> : vector<1xf32>
      %27 = vector.multi_reduction <add>, %26, %cst_23 [1, 2] : vector<1x128x256xf32> to vector<1xf32>
      %28 = vector.shape_cast %27 : vector<1xf32> to vector<1x1x1xf32>
      %29 = vector.extract %28[0, 0, 0] : f32 from vector<1x1x1xf32>
      %30 = tpu.iota {dimensions = array<i32: 2>} : vector<1x8x128xi32>
      %c0_i32_24 = arith.constant 0 : i32
      %31 = vector.broadcast %c0_i32_24 : i32 to vector<1x8x128xi32>
      %32 = arith.cmpi eq, %30, %31 : vector<1x8x128xi32>
      %c1_i32 = arith.constant 1 : i32
      %33 = vector.broadcast %c1_i32 : i32 to vector<1x8x128xi32>
      %34 = arith.cmpi eq, %30, %33 : vector<1x8x128xi32>
      %cst_25 = arith.constant 0.000000e+00 : f32
      %35 = vector.broadcast %29 : f32 to vector<1x8x128xf32>
      %36 = vector.broadcast %cst_25 : f32 to vector<1x8x128xf32>
      %37 = arith.select %34, %35, %36 : vector<1x8x128xi1>, vector<1x8x128xf32>
      %38 = vector.broadcast %24 : f32 to vector<1x8x128xf32>
      %39 = arith.select %32, %38, %37 : vector<1x8x128xi1>, vector<1x8x128xf32>
      %c0_26 = arith.constant 0 : index
      %c0_27 = arith.constant 0 : index
      %c0_28 = arith.constant 0 : index
      %40 = vector.load %arg6[%c0_26, %c0_27, %c0_28] : memref<1x8x128xf32, #tpu.memory_space<vmem>>, vector<1x8x128xf32>
      tpu.vector_store %arg6[%c0_26, %c0_27, %c0_28], %39 {strides = array<i32>} : memref<1x8x128xf32, #tpu.memory_space<vmem>>, vector<1x8x128xf32>,
    } else {
    }
    return
  }
  func.func @transform_0(%arg0: i32, %arg1: i32) -> (i32, i32) {
    %c0_i32 = arith.constant 0 : i32
    %c0_i32_0 = arith.constant 0 : i32
    return %arg0, %c0_i32 : i32, i32
  }
  func.func @transform_1(%arg0: i32, %arg1: i32) -> (i32, i32) {
    %c0_i32 = arith.constant 0 : i32
    %c0_i32_0 = arith.constant 0 : i32
    return %arg1, %c0_i32 : i32, i32
  }
  func.func @transform_2(%arg0: i32, %arg1: i32) -> (i32, i32) {
    %c0_i32 = arith.constant 0 : i32
    return %arg0, %arg1 : i32, i32
  }
  func.func @transform_3(%arg0: i32, %arg1: i32) -> (i32, i32) {
    %c0_i32 = arith.constant 0 : i32
    return %arg0, %arg1 : i32, i32
  }
  func.func @transform_4(%arg0: i32, %arg1: i32) -> (i32, i32, i32) {
    %c0_i32 = arith.constant 0 : i32
    %c0_i32_0 = arith.constant 0 : i32
    %c0_i32_1 = arith.constant 0 : i32
    return %arg0, %c0_i32, %c0_i32_0 : i32, i32, i32
  }
}

</mosaic_0001>

<bundles_post_ra>
// kernel: tpu_custom_call.1
= control target key start
LH: loop header
LB: loop body
LE: loop exit
PB: predicated region body
PF: predicated region fallthrough
CT: control target
= control target key end

     0   :  { %9 = vsyncpa [#allocation5], 0  ;;  %s2456_s0 = inlined_call_operand.vmem [shape: f32[256,32], index: 0, kind: input, shape index: {}]   ;;  %s2457_s1 = inlined_call_operand.vmem [shape: f32[256,32], index: 1, kind: input, shape index: {}]   ;;  %s2458_s2 = inlined_call_operand.vmem [shape: f32[256,256], index: 2, kind: input, shape index: {}]   ;;  %s2459_s3 = inlined_call_operand.hbm [shape: f32[256,256], index: 3, kind: input, shape index: {}]   ;;  %s2460_s4 = inlined_call_operand.hbm [shape: f32[2,8,128], index: 4, kind: output, shape index: {}]  }
   0x1   :  { %11 = vsyncpa [#allocation5 + $0x1], 0 }
   0x2   :  { %12 = vsyncpa [#allocation6], 0 }
   0x3   :  { %14 = vsyncpa [#allocation6 + $0x1], 0  ;;  %s1897_s15 = smov 0   ;;  %s1899_s16 = smov 0  }
   0x4   :  { %s1901_s17 = smov 0   ;;  %s1903_s18 = smov 0  }
   0x5   :  { %s1905_s19 = smov 0   ;;  %s1907_s20 = smov 0  }
   0x6 LB: > { %s1422_s21 = sadd.s32 4294967295, %s1866_s20   ;;  %s1423_s22 = sadd.s32 4294967294, %s1866_s20   ;;  %s1866_s20 = sphi %s1907_s20, %s20_s20   ;;  %s1862_s19 = sphi %s1905_s19, %s2477_s19   ;;  %s1858_s18 = sphi %s1903_s18, %s2476_s18   ;;  %s1854_s17 = sphi %s1901_s17, %s2475_s17   ;;  %s1850_s16 = sphi %s1899_s16, %s2474_s16   ;;  %s1846_s15 = sphi %s1897_s15, %s2473_s15  }
   0x7   : > { %s32_s23 = sadd.s32 1, %s1862_s19  ;;  %s121_s24 = sadd.s32 1, %s1854_s17 }
   0x8   : > { %p34_p0 = scmp.ge.s32.totalorder %s32_s23, 2  ;;  %p128_p1 = scmp.ne.s32.totalorder %s1854_s17, %s1850_s16 }
   0x9   : > { %p129_p2 = scmp.eq.s32.totalorder %s1866_s20, 0  ;;  %p134_p3 = scmp.ne.s32.totalorder %s1850_s16, %s1846_s15 }
   0xa   : > { %s2479_s23 = smov (%p34_p0, %s32_s23), 0  ;;  %p135_p5 = scmp.eq.s32.totalorder %s1422_s21, 0 }
   0xb   : > { %p1938_p4 = por %p129_p2, %p128_p1  ;;  %s116_s26 = ssub.s32 %s1862_s19, %s2479_s23 }
   0xc   : > { %p158_p6 = scmp.eq.s32.totalorder %s1422_s21, 1  ;;  %p119_p7 = scmp.eq.s32.totalorder %s116_s26, 0 }
   0xd   : > { %p1944_p8 = por %p135_p5, %p134_p3  ;;  %p164_p10 = scmp.eq.s32.totalorder %s1423_s22, 1 }
   0xe   : > { %p1948_p9 = por %p158_p6, %p128_p1  ;;  %p1638_p13 = scmp.lt.s32.totalorder %s1866_s20, 2 }
   0xf   : > { %s1953_s29 = scalar_select %p119_p7, %s1854_s17, %s121_s24  }
  0x10   : > { %s2464_s28 = scalar_select %p1948_p9, 1, 0 }
  0x11   : > { %p1955_p11 = por %p164_p10, %p134_p3  ;;  %s217_s5 = sand.u32 1, %s1854_s17  }
  0x12   : > { %s1427_s6 = sshll.u32 %s217_s5, 8  ;;  %s1492_s7 = sshll.u32 %s1862_s19, 12 }
  0x13   : > { %s2465_s30 = scalar_select %p1955_p11, 1, 0 }
  0x14   : > { %s1966_s10 = scalar_lea.hbm %s2459_s3, %s1492_s7  ;;  %s221_s11 = scalar_lea.vmem [#allocation4], %s1427_s6 }
  0x15   : > { %s231_s12 = sshll.u32 %s221_s11, 4  ;;  %p1972_p0 = pnand %p1638_p13, %p1938_p4  ;;  %s1968_s12 = int_to_ptr.vmem [resolvable:$true] %s231_s12 }
  0x16   : > { %s1977_s14 = scalar_lea.sflag [#allocation5], %s217_s5  ;;  %s1754_s21 = scalar_lea.hbm %s1966_s10, 4096 }
  0x17   : > { %p1755_p2 = scmp.ne.s32.totalorder %s1966_s10, %s1754_s21  ;;  %p1756_p3 = pneg %p1972_p0 }
  0x18   : > { %s1759_s25 = scalar_lea.hbm %s2459_s3, 8192  ;;  %p1760_p4 = scmp.lt.u32.totalorder %s1966_s10, %s2459_s3 }
  0x19   : > { %p1757_p5 = pnand %p1756_p3, %p1755_p2  ;;  %p1761_p7 = scmp.lt.u32.totalorder %s1759_s25, %s1754_s21 }
  0x1a   : > { %p1763_p13 = scmp.lt.u32.totalorder %s1754_s21, %s1966_s10 }
  0x1b   : > { %p1758_p6 = pneg %p1757_p5  ;;  %p1762_p10 = por %p1761_p7, %p1760_p4 }
  0x1d   : > { %p1764_p12 = por %p1763_p13, %p1762_p10 }
  0x1f   : > { %p1765_p1 = pnand %p1764_p12, %p1758_p6 }
  0x21   : > { %1768 = shalt.err (!%p1765_p1)
}
  0x22   : > { %s1769_s5 = scalar_lea.vmem %s1968_s12, 4096  ;;  %s1868_s7 = smov [#allocation4]  }
  0x23   : > { %p1770_p2 = scmp.ne.s32.totalorder %s1968_s12, %s1769_s5  ;;  %s1774_s8 = sshll.u32 %s1868_s7, 4  ;;  %s1775_s8 = int_to_ptr.vmem [resolvable:$false] %s1774_s8 }
  0x24   : > { %s1776_s9 = scalar_lea.vmem %s1775_s8, 8192  ;;  %p1777_p9 = scmp.lt.s32.totalorder %s1968_s12, %s1775_s8 }
  0x25   : > { %p1772_p5 = pnand %p1770_p2, %p1756_p3  ;;  %p1778_p4 = scmp.lt.s32.totalorder %s1776_s9, %s1769_s5 }
  0x27   : > { %p1773_p11 = pneg %p1772_p5  ;;  %p1779_p7 = por %p1778_p4, %p1777_p9 }
  0x29   : > { %p1780_p10 = pnand %p1779_p7, %p1773_p11 }
  0x2b   : > { %1783 = shalt.err (!%p1780_p10)
}
  0x2c   : > { %s1869_s11 = smov 256   ;;  %s1870_s21 = smov 16  }
  0x2d   : > { %1633 = dma.hbm_to_vmem [thread:$0]  (!%p1972_p0), %s1966_s10, 4096, %s1968_s12, %s1977_s14, %s1869_s11, %s1869_s11, %s1870_s21  }
  0x2e   : > { %p239_p12 = scmp.lt.s32.totalorder %s1866_s20, 3  ;;  %p2467_p1 = scmp.ge.s32.totalorder %s1866_s20, 1 }
  0x30   : > { %p240_p3 = pnand %p2467_p1, %p239_p12 }
  0x31   : > { %s2009_s22 = sand.u32 (!%p240_p3), 1, %s1850_s16  }
  0x32   : > { %243 = sbr.rel (%p240_p3) target bundleno = 642 (0x282), region = 36  ;;  %s1432_s24 = sshll.u32 (!%p240_p3), %s2009_s22, 8 }
  0x33   : > { %s246_s25 = scalar_lea.sflag (!%p240_p3), [#allocation5], %s2009_s22  ;;  %s2013_s26 = scalar_lea.vmem (!%p240_p3), [#allocation4], %s1432_s24 }
  0x39   : > { %1837 = dma.done.wait (%p1944_p8), %s246_s25, 4096  }
  0x3a   : > { %1839 = vsyncadd (%p1944_p8), %s246_s25, 4294963200  ;;  %s1434_s10 = sshll.u32 %s1858_s18, 4  ;;  %vm436_vm0 = vcmask 261120   ;;  %v420_v1 = vld [vmem:[%s2457_s1 + $0x80] sm:$0xff]  ;;  %v421_v2 = vld [vmem:[%s2457_s1 + $0x88] sm:$0xff]  ;;  %p2470_p11 = scmp.ne.s32.totalorder %s2464_s28, 0 }
  0x3b   : > { %p295_p9 = scmp.lt.s32.totalorder %s1434_s10, 31  ;;  %vm2022_vm1 = vmpackc.low %vm436_vm0, %vm436_vm0  ;;  %v404_v3 = vld [vmem:[%s2457_s1] sm:$0xff]  ;;  %v1558_v4 = vpack.c.bf16 %v421_v2, %v420_v1  ;;  %v405_v5 = vld [vmem:[%s2457_s1 + $0x8] sm:$0xff]  ;;  %s1871_s5 = smov [#allocation7]  }
  0x3c   : > { %v422_v6 = vld [vmem:[%s2457_s1 + $0x90] sm:$0xff]  ;;  %v423_v7 = vld [vmem:[%s2457_s1 + $0x98] sm:$0xff]  ;;  %v1561_v8 = vpack.c.bf16 %v405_v5, %v404_v3  ;;  %v424_v12 = vld [vmem:[%s2457_s1 + $0xa0] sm:$0xff] }
  0x3d   : > { %s2481_s10 = smov (!%p295_p9, %s1434_s10), 31  ;;  %v1564_v9 = vpack.c.bf16 %v423_v7, %v422_v6  ;;  %1560 = vmatprep.subr.msk.bf16.mxu0 %vm2022_vm1, %v1558_v4  ;;  %1606 = vmatprep.subr.msk.bf16.mxu1 %vm2022_vm1, %v1558_v4  ;;  %v406_v10 = vld [vmem:[%s2457_s1 + $0x10] sm:$0xff]  ;;  %v407_v11 = vld [vmem:[%s2457_s1 + $0x18] sm:$0xff]  ;;  %v425_v13 = vld [vmem:[%s2457_s1 + $0xa8] sm:$0xff] }
  0x3e   : > { %1563 = vmatpush3.bf16.xpose.msk.msra.mxu0 %vm2022_vm1, %v1561_v8  ;;  %1614 = vmatpush3.bf16.xpose.msk.msra.mxu1 %vm2022_vm1, %v1561_v8  ;;  %s1435_s25 = sshll.u32 %s2481_s10, 3  ;;  %v1567_v14 = vpack.c.bf16 %v407_v11, %v406_v10  ;;  %v1570_v15 = vpack.c.bf16 %v425_v13, %v424_v12  ;;  %v408_v17 = vld [vmem:[%s2457_s1 + $0x20] sm:$0xff]  ;;  %v409_v18 = vld [vmem:[%s2457_s1 + $0x28] sm:$0xff]  ;;  %v426_v20 = vld [vmem:[%s2457_s1 + $0xb0] sm:$0xff] }
  0x3f   : > { %1566 = vmatprep.subr.msk.bf16.mxu0 %vm2022_vm1, %v1564_v9  ;;  %1607 = vmatprep.subr.msk.bf16.mxu1 %vm2022_vm1, %v1564_v9  ;;  %s2074_s21 = scalar_lea.vmem %s2456_s0, %s1435_s25  ;;  %v427_v21 = vld [vmem:[%s2457_s1 + $0xb8] sm:$0xff]  ;;  %v1573_v22 = vpack.c.bf16 %v409_v18, %v408_v17  ;;  %v410_v24 = vld [vmem:[%s2457_s1 + $0x30] sm:$0xff]  ;;  %v428_v26 = vld [vmem:[%s2457_s1 + $0xc0] sm:$0xff] }
  0x40   : > { %v2077_v16 = vld [vmem:[%s2074_s21] sm:$0xff]  ;;  %v1576_v23 = vpack.c.bf16 %v427_v21, %v426_v20  ;;  %v411_v25 = vld [vmem:[%s2457_s1 + $0x38] sm:$0xff]  ;;  %v429_v27 = vld [vmem:[%s2457_s1 + $0xc8] sm:$0xff] }
  0x41   : > { %1526 = vmatprep.mubr.msk.f32.mxu0 %vm436_vm0, %v2077_v16  ;;  %v396_v19 = vld [vmem:[%s2074_s21 + $0x40] sm:$0xff]  ;;  %v1579_v28 = vpack.c.bf16 %v411_v25, %v410_v24  ;;  %v1582_v29 = vpack.c.bf16 %v429_v27, %v428_v26  ;;  %v413_v31 = vld [vmem:[%s2457_s1 + $0x48] sm:$0xff]  ;;  %v430_v32 = vld [vmem:[%s2457_s1 + $0xd0] sm:$0xff] }
  0x42   : > { %1542 = vmatprep.mubr.msk.f32.mxu1 %vm436_vm0, %v396_v19  ;;  %v412_v30 = vld [vmem:[%s2457_s1 + $0x40] sm:$0xff]  ;;  %v431_v33 = vld [vmem:[%s2457_s1 + $0xd8] sm:$0xff]  ;;  %v414_v36 = vld [vmem:[%s2457_s1 + $0x50] sm:$0xff] }
  0x43   : > { %v1585_v34 = vpack.c.bf16 %v413_v31, %v412_v30  ;;  %v1588_v35 = vpack.c.bf16 %v431_v33, %v430_v32  ;;  %v415_v37 = vld [vmem:[%s2457_s1 + $0x58] sm:$0xff]  ;;  %v432_v38 = vld [vmem:[%s2457_s1 + $0xe0] sm:$0xff]  ;;  %v433_v39 = vld [vmem:[%s2457_s1 + $0xe8] sm:$0xff] }
  0x44   : > { %v1591_v40 = vpack.c.bf16 %v415_v37, %v414_v36  ;;  %v1594_v41 = vpack.c.bf16 %v433_v39, %v432_v38  ;;  %v416_v42 = vld [vmem:[%s2457_s1 + $0x60] sm:$0xff]  ;;  %v417_v43 = vld [vmem:[%s2457_s1 + $0x68] sm:$0xff]  ;;  %v434_v44 = vld [vmem:[%s2457_s1 + $0xf0] sm:$0xff] }
  0x45   : > { %v435_v45 = vld [vmem:[%s2457_s1 + $0xf8] sm:$0xff]  ;;  %v1597_v46 = vpack.c.bf16 %v417_v43, %v416_v42  ;;  %v418_v48 = vld [vmem:[%s2457_s1 + $0x70] sm:$0xff]  ;;  %v389_v51 = vld [vmem:[%s2074_s21 + $0x8] sm:$0xff] }
  0x46   : > { %1569 = vmatpush3.bf16.xpose.msk.msra.mxu0 %vm2022_vm1, %v1567_v14  ;;  %1615 = vmatpush3.bf16.xpose.msk.msra.mxu1 %vm2022_vm1, %v1567_v14  ;;  %v1600_v47 = vpack.c.bf16 %v435_v45, %v434_v44  ;;  %v419_v49 = vld [vmem:[%s2457_s1 + $0x78] sm:$0xff]  ;;  %v397_v52 = vld [vmem:[%s2074_s21 + $0x48] sm:$0xff]  ;;  %v390_v53 = vld [vmem:[%s2074_s21 + $0x10] sm:$0xff] }
  0x47   : > { %1572 = vmatprep.subr.msk.bf16.mxu0 %vm2022_vm1, %v1570_v15  ;;  %1608 = vmatprep.subr.msk.bf16.mxu1 %vm2022_vm1, %v1570_v15  ;;  %v1603_v50 = vpack.c.bf16 %v419_v49, %v418_v48  ;;  %v398_v54 = vld [vmem:[%s2074_s21 + $0x50] sm:$0xff]  ;;  %v391_v55 = vld [vmem:[%s2074_s21 + $0x18] sm:$0xff]  ;;  %v392_v57 = vld [vmem:[%s2074_s21 + $0x20] sm:$0xff] }
  0x48   : > { %v399_v56 = vld [vmem:[%s2074_s21 + $0x58] sm:$0xff]  ;;  %v400_v58 = vld [vmem:[%s2074_s21 + $0x60] sm:$0xff]  ;;  %v393_v59 = vld [vmem:[%s2074_s21 + $0x28] sm:$0xff] }
  0x49   : > { %v401_v60 = vld [vmem:[%s2074_s21 + $0x68] sm:$0xff]  ;;  %v394_v61 = vld [vmem:[%s2074_s21 + $0x30] sm:$0xff]  ;;  %v395_v63 = vld [vmem:[%s2074_s21 + $0x38] sm:$0xff] }
  0x4a   : > { %v402_v62 = vld [vmem:[%s2074_s21 + $0x70] sm:$0xff]  ;;  %v403_v0 = vld [vmem:[%s2074_s21 + $0x78] sm:$0xff]  ;;  %s1493_s21 = sshll.u32 %s2481_s10, 4  ;;  %v966_v26 = vld [vmem:[%s2013_s26] sm:$0xff]  ;;  %s1488_s10 = sshll.u32 %s1858_s18, 7 }
  0x4b   : > { %s2250_s9 = scalar_lea.vmem %s2458_s2, %s1493_s21  ;;  %v968_v45 = vld [vmem:[%s2013_s26 + $0x10] sm:$0xff]  ;;  %v969_v48 = vld [vmem:[%s2013_s26 + $0x18] sm:$0xff]  ;;  %s2407_s6 = scalar_lea.hbm %s2460_s4, %s1488_s10 }
  0x4c   : > { %v806_v25 = vld [vmem:[%s2250_s9] sm:$0xff]  ;;  %v807_v27 = vld [vmem:[%s2250_s9 + $0x8] sm:$0xff]  ;;  %v808_v44 = vld [vmem:[%s2250_s9 + $0x10] sm:$0xff]  ;;  %s1283_s18 = scalar_lea.sflag [#allocation6], %s2009_s22  ;;  %s1788_s21 = sshll.u32 %s1871_s5, 4  ;;  %s1789_s21 = int_to_ptr.vmem [resolvable:$false] %s1788_s21 }
  0x4d   : > { %s1790_s7 = scalar_lea.vmem %s1789_s21, 256 }
  0x4e   : > { %1575 = vmatpush3.bf16.xpose.msk.msra.mxu0 %vm2022_vm1, %v1573_v22  ;;  %1616 = vmatpush3.bf16.xpose.msk.msra.mxu1 %vm2022_vm1, %v1573_v22 }
  0x4f   : > { %1578 = vmatprep.subr.msk.bf16.mxu0 %vm2022_vm1, %v1576_v23  ;;  %1609 = vmatprep.subr.msk.bf16.mxu1 %vm2022_vm1, %v1576_v23 }
  0x56   : > { %1581 = vmatpush3.bf16.xpose.msk.msra.mxu0 %vm2022_vm1, %v1579_v28  ;;  %1617 = vmatpush3.bf16.xpose.msk.msra.mxu1 %vm2022_vm1, %v1579_v28  ;;  %v967_v28 = vld [vmem:[%s2013_s26 + $0x8] sm:$0xff] }
  0x57   : > { %1584 = vmatprep.subr.msk.bf16.mxu0 %vm2022_vm1, %v1582_v29  ;;  %1610 = vmatprep.subr.msk.bf16.mxu1 %vm2022_vm1, %v1582_v29 }
  0x5e   : > { %1587 = vmatpush3.bf16.xpose.msk.msra.mxu0 %vm2022_vm1, %v1585_v34  ;;  %1618 = vmatpush3.bf16.xpose.msk.msra.mxu1 %vm2022_vm1, %v1585_v34  ;;  %v822_v34 = vld [vmem:[%s2250_s9 + $0x80] sm:$0xff] }
  0x5f   : > { %1590 = vmatprep.subr.msk.bf16.mxu0 %vm2022_vm1, %v1588_v35  ;;  %1611 = vmatprep.subr.msk.bf16.mxu1 %vm2022_vm1, %v1588_v35 }
  0x66   : > { %1593 = vmatpush3.bf16.xpose.msk.msra.mxu0 %vm2022_vm1, %v1591_v40  ;;  %1619 = vmatpush3.bf16.xpose.msk.msra.mxu1 %vm2022_vm1, %v1591_v40  ;;  %v823_v40 = vld [vmem:[%s2250_s9 + $0x88] sm:$0xff] }
  0x67   : > { %1596 = vmatprep.subr.msk.bf16.mxu0 %vm2022_vm1, %v1594_v41  ;;  %1612 = vmatprep.subr.msk.bf16.mxu1 %vm2022_vm1, %v1594_v41 }
  0x6e   : > { %1599 = vmatpush3.bf16.xpose.msk.msra.mxu0 %vm2022_vm1, %v1597_v46  ;;  %1620 = vmatpush3.bf16.xpose.msk.msra.mxu1 %vm2022_vm1, %v1597_v46 }
  0x6f   : > { %1602 = vmatprep.subr.msk.bf16.mxu0 %vm2022_vm1, %v1600_v47  ;;  %1613 = vmatprep.subr.msk.bf16.mxu1 %vm2022_vm1, %v1600_v47  ;;  %v809_v47 = vld [vmem:[%s2250_s9 + $0x18] sm:$0xff] }
  0x76   : > { %1605 = vmatpush3.bf16.xpose.msk.msra.mxu0 %vm2022_vm1, %v1603_v50  ;;  %1621 = vmatpush3.bf16.xpose.msk.msra.mxu1 %vm2022_vm1, %v1603_v50 }
  0x7d   : > { %1527 = vmatmul.mubr.msk.f32.vlgmr.msra.gmra.mrb[0].mxu0 %vm436_vm0, %v2077_v16  ;;  %1543 = vmatmul.mubr.msk.f32.vlgmr.msra.gmra.mrb[0].mxu1 %vm436_vm0, %v396_v19 }
  0x7e   : > { %1528 = vmatprep.mubr.msk.f32.mxu0 %vm436_vm0, %v389_v51  ;;  %1544 = vmatprep.mubr.msk.f32.mxu1 %vm436_vm0, %v397_v52 }
  0x81   : > { %1529 = vmatmul.mubr.msk.f32.gmra.mrb[2].mxu0 %vm436_vm0, %v389_v51  ;;  %1545 = vmatmul.mubr.msk.f32.gmra.mrb[2].mxu1 %vm436_vm0, %v397_v52 }
  0x82   : > { %1530 = vmatprep.mubr.msk.f32.mxu0 %vm436_vm0, %v390_v53  ;;  %1546 = vmatprep.mubr.msk.f32.mxu1 %vm436_vm0, %v398_v54 }
  0x85   : > { %1531 = vmatmul.mubr.msk.f32.gmra.mrb[4].mxu0 %vm436_vm0, %v390_v53  ;;  %1547 = vmatmul.mubr.msk.f32.gmra.mrb[4].mxu1 %vm436_vm0, %v398_v54 }
  0x86   : > { %1532 = vmatprep.mubr.msk.f32.mxu0 %vm436_vm0, %v391_v55  ;;  %1548 = vmatprep.mubr.msk.f32.mxu1 %vm436_vm0, %v399_v56 }
  0x89   : > { %1533 = vmatmul.mubr.msk.f32.gmra.mrb[6].mxu0 %vm436_vm0, %v391_v55  ;;  %1549 = vmatmul.mubr.msk.f32.gmra.mrb[6].mxu1 %vm436_vm0, %v399_v56 }
  0x8a   : > { %1534 = vmatprep.mubr.msk.f32.mxu0 %vm436_vm0, %v392_v57  ;;  %1550 = vmatprep.mubr.msk.f32.mxu1 %vm436_vm0, %v400_v58 }
  0x8d   : > { %1535 = vmatmul.mubr.msk.f32.gmra.mrb[8].mxu0 %vm436_vm0, %v392_v57  ;;  %1551 = vmatmul.mubr.msk.f32.gmra.mrb[8].mxu1 %vm436_vm0, %v400_v58  ;;  %v824_v58 = vld [vmem:[%s2250_s9 + $0x90] sm:$0xff] }
  0x8e   : > { %1536 = vmatprep.mubr.msk.f32.mxu0 %vm436_vm0, %v393_v59  ;;  %1552 = vmatprep.mubr.msk.f32.mxu1 %vm436_vm0, %v401_v60 }
  0x91   : > { %1537 = vmatmul.mubr.msk.f32.gmra.mrb[10].mxu0 %vm436_vm0, %v393_v59  ;;  %1553 = vmatmul.mubr.msk.f32.gmra.mrb[10].mxu1 %vm436_vm0, %v401_v60 }
  0x92   : > { %1538 = vmatprep.mubr.msk.f32.mxu0 %vm436_vm0, %v394_v61  ;;  %1554 = vmatprep.mubr.msk.f32.mxu1 %vm436_vm0, %v402_v62 }
  0x95   : > { %1539 = vmatmul.mubr.msk.f32.gmra.mrb[12].mxu0 %vm436_vm0, %v394_v61  ;;  %1555 = vmatmul.mubr.msk.f32.gmra.mrb[12].mxu1 %vm436_vm0, %v402_v62 }
  0x96   : > { %1540 = vmatprep.mubr.msk.f32.mxu0 %vm436_vm0, %v395_v63  ;;  %1556 = vmatprep.mubr.msk.f32.mxu1 %vm436_vm0, %v403_v0 }
  0x99   : > { %1541 = vmatmul.mubr.msk.f32.gmra.mrb[14].mxu0 %vm436_vm0, %v395_v63  ;;  %1557 = vmatmul.mubr.msk.f32.gmra.mrb[14].mxu1 %vm436_vm0, %v403_v0  ;;  %v825_v0 = vld [vmem:[%s2250_s9 + $0x98] sm:$0xff] }
 0x150   : > { %v647_v1 = vpop.f32.mrb[0].mxu0  ;;  %v695_v2 = vpop.f32.mrb[0].mxu1 }
 0x151   : > { %v742_v3 = vmul.f32 1.442695, %v647_v1  ;;  %v649_v4 = vpop.f32.mrb[1].mxu0  ;;  %v774_v5 = vmul.f32 1.442695, %v695_v2  ;;  %v697_v6 = vpop.f32.mrb[1].mxu1 }
 0x152   : > { %v744_v7 = vmul.f32 1.442695, %v649_v4  ;;  %v776_v8 = vmul.f32 1.442695, %v697_v6  ;;  %v810_v4 = vld [vmem:[%s2250_s9 + $0x20] sm:$0xff] }
 0x153   : > { %1690 = vpow2.f32 %v742_v3 }
 0x154   : > { %1692 = vpow2.f32 %v744_v7  ;;  %v653_v9 = vpop.f32.mrb[2].mxu0  ;;  %v701_v10 = vpop.f32.mrb[2].mxu1 }
 0x155   : > { %v746_v11 = vmul.f32 1.442695, %v653_v9  ;;  %v655_v12 = vpop.f32.mrb[3].mxu0  ;;  %1694 = vpow2.f32 %v774_v5  ;;  %v778_v13 = vmul.f32 1.442695, %v701_v10  ;;  %v703_v14 = vpop.f32.mrb[3].mxu1 }
 0x156   : > { %v748_v15 = vmul.f32 1.442695, %v655_v12  ;;  %1696 = vpow2.f32 %v776_v8  ;;  %v780_v16 = vmul.f32 1.442695, %v703_v14  ;;  %v970_v5 = vld [vmem:[%s2013_s26 + $0x20] sm:$0xff]  ;;  %v811_v9 = vld [vmem:[%s2250_s9 + $0x28] sm:$0xff] }
 0x157   : > { %1698 = vpow2.f32 %v746_v11  ;;  %v971_v10 = vld [vmem:[%s2013_s26 + $0x28] sm:$0xff] }
 0x158   : > { %1700 = vpow2.f32 %v748_v15  ;;  %v659_v17 = vpop.f32.mrb[4].mxu0  ;;  %v707_v18 = vpop.f32.mrb[4].mxu1 }
 0x159   : > { %v750_v19 = vmul.f32 1.442695, %v659_v17  ;;  %v661_v20 = vpop.f32.mrb[5].mxu0  ;;  %1702 = vpow2.f32 %v778_v13  ;;  %v782_v21 = vmul.f32 1.442695, %v707_v18  ;;  %v709_v22 = vpop.f32.mrb[5].mxu1 }
 0x15a   : > { %v752_v23 = vmul.f32 1.442695, %v661_v20  ;;  %1704 = vpow2.f32 %v780_v16  ;;  %v784_v24 = vmul.f32 1.442695, %v709_v22  ;;  %v826_v18 = vld [vmem:[%s2250_s9 + $0xa0] sm:$0xff] }
 0x15b   : > { %1706 = vpow2.f32 %v750_v19 }
 0x15c   : > { %1708 = vpow2.f32 %v752_v23  ;;  %v665_v29 = vpop.f32.mrb[6].mxu0  ;;  %v2256_v30 = vpop.f32.mrb[6].mxu1 }
 0x15d   : > { %v1691_v31 = vpop.eup %1690  ;;  %v754_v32 = vmul.f32 1.442695, %v665_v29  ;;  %v667_v33 = vpop.f32.mrb[7].mxu0  ;;  %1710 = vpow2.f32 %v782_v21  ;;  %v812_v29 = vld [vmem:[%s2250_s9 + $0x30] sm:$0xff] }
 0x15e   : > { %v2259_v35 = vpop.f32.mrb[7].mxu1  ;;  %v1693_v36 = vpop.eup %1692  ;;  %v870_v37 = vmul.f32 %v1691_v31, %v806_v25  ;;  %v1030_v38 = vmul.f32 %v1691_v31, %v966_v26  ;;  %v756_v39 = vmul.f32 1.442695, %v667_v33  ;;  %1712 = vpow2.f32 %v784_v24  ;;  %v827_v25 = vld [vmem:[%s2250_s9 + $0xa8] sm:$0xff]  ;;  %v972_v31 = vld [vmem:[%s2013_s26 + $0x30] sm:$0xff] }
 0x15f   : > { %v2262_v41 = vpop.eup %1694  ;;  %v871_v42 = vmul.f32 %v1693_v36, %v807_v27  ;;  %v1031_v43 = vmul.f32 %v1693_v36, %v967_v28  ;;  %1714 = vpow2.f32 %v754_v32 }
 0x160   : > { %v2266_v46 = vpop.eup %1696  ;;  %1716 = vpow2.f32 %v756_v39  ;;  %v671_v49 = vpop.f32.mrb[8].mxu0  ;;  %v2271_v50 = vmul.f32 %v2262_v41, %v822_v34 }
 0x161   : > { %v2273_v51 = vpop.f32.mrb[8].mxu1  ;;  %v1699_v52 = vpop.eup %1698  ;;  %v1161_v53 = vadd.f32 %v871_v42, %v870_v37  ;;  %v1233_v54 = vadd.f32 %v1031_v43, %v1030_v38  ;;  %v758_v55 = vmul.f32 1.442695, %v671_v49  ;;  %v2276_v57 = vmul.f32 %v2266_v46, %v823_v40  ;;  %v813_v37 = vld [vmem:[%s2250_s9 + $0x38] sm:$0xff] }
 0x162   : > { %v673_v56 = vpop.f32.mrb[9].mxu0  ;;  %v2279_v59 = vpop.f32.mrb[9].mxu1  ;;  %v872_v61 = vmul.f32 %v1699_v52, %v808_v44  ;;  %v1032_v62 = vmul.f32 %v1699_v52, %v968_v45  ;;  %v973_v38 = vld [vmem:[%s2013_s26 + $0x38] sm:$0xff]  ;;  %v786_v42 = vmul.f32 1.442695, %v2256_v30 }
 0x163   : > { %v1701_v60 = vpop.eup %1700  ;;  %v760_v63 = vmul.f32 1.442695, %v673_v56  ;;  %1718 = vpow2.f32 %v758_v55 }
 0x164   : > { %v2282_v1 = vpop.eup %1702  ;;  %v873_v2 = vmul.f32 %v1701_v60, %v809_v47  ;;  %v1033_v3 = vmul.f32 %v1701_v60, %v969_v48  ;;  %v1162_v7 = vadd.f32 %v1161_v53, %v872_v61  ;;  %v1234_v8 = vadd.f32 %v1233_v54, %v1032_v62  ;;  %v677_v11 = vpop.f32.mrb[10].mxu0  ;;  %v814_v60 = vld [vmem:[%s2250_s9 + $0x40] sm:$0xff] }
 0x165   : > { %v2286_v6 = vpop.eup %1704  ;;  %1720 = vpow2.f32 %v760_v63  ;;  %v2291_v12 = vmul.f32 %v2282_v1, %v824_v58  ;;  %v2293_v13 = vpop.f32.mrb[10].mxu1  ;;  %v762_v15 = vmul.f32 1.442695, %v677_v11  ;;  %v974_v61 = vld [vmem:[%s2013_s26 + $0x40] sm:$0xff]  ;;  %v790_v11 = vmul.f32 1.442695, %v2273_v51 }
 0x166   : > { %v1707_v14 = vpop.eup %1706  ;;  %v679_v16 = vpop.f32.mrb[11].mxu0  ;;  %v2296_v17 = vmul.f32 %v2286_v6, %v825_v0  ;;  %v1163_v21 = vadd.f32 %v1162_v7, %v873_v2  ;;  %v1235_v22 = vadd.f32 %v1234_v8, %v1033_v3  ;;  %v815_v2 = vld [vmem:[%s2250_s9 + $0x48] sm:$0xff] }
 0x167   : > { %v2299_v19 = vpop.f32.mrb[11].mxu1  ;;  %v1709_v20 = vpop.eup %1708  ;;  %v874_v23 = vmul.f32 %v1707_v14, %v810_v4  ;;  %v1034_v24 = vmul.f32 %v1707_v14, %v970_v5  ;;  %1722 = vpow2.f32 %v762_v15  ;;  %v764_v32 = vmul.f32 1.442695, %v679_v16  ;;  %v975_v3 = vld [vmem:[%s2013_s26 + $0x48] sm:$0xff] }
 0x168   : > { %v2302_v26 = vpop.eup %1710  ;;  %v875_v27 = vmul.f32 %v1709_v20, %v811_v9  ;;  %v1035_v28 = vmul.f32 %v1709_v20, %v971_v10  ;;  %v683_v39 = vpop.f32.mrb[12].mxu0  ;;  %v788_v5 = vmul.f32 1.442695, %v2259_v35 }
 0x169   : > { %v2306_v33 = vpop.eup %1712  ;;  %v1164_v34 = vadd.f32 %v1163_v21, %v874_v23  ;;  %v1236_v36 = vadd.f32 %v1235_v22, %v1034_v24  ;;  %v2311_v40 = vmul.f32 %v2302_v26, %v826_v18  ;;  %v2314_v43 = vpop.f32.mrb[12].mxu1  ;;  %1724 = vpow2.f32 %v764_v32  ;;  %v816_v23 = vld [vmem:[%s2250_s9 + $0x50] sm:$0xff] }
 0x16a   : > { %v1715_v44 = vpop.eup %1714  ;;  %v766_v45 = vmul.f32 1.442695, %v683_v39  ;;  %v685_v47 = vpop.f32.mrb[13].mxu0  ;;  %v2317_v48 = vmul.f32 %v2306_v33, %v827_v25  ;;  %v976_v24 = vld [vmem:[%s2013_s26 + $0x50] sm:$0xff]  ;;  %v792_v32 = vmul.f32 1.442695, %v2279_v59 }
 0x16b   : > { %v2319_v49 = vpop.f32.mrb[13].mxu1  ;;  %v1717_v52 = vpop.eup %1716  ;;  %v1165_v53 = vadd.f32 %v1164_v34, %v875_v27  ;;  %v1237_v54 = vadd.f32 %v1236_v36, %v1035_v28  ;;  %v876_v55 = vmul.f32 %v1715_v44, %v812_v29  ;;  %v1036_v56 = vmul.f32 %v1715_v44, %v972_v31  ;;  %v817_v29 = vld [vmem:[%s2250_s9 + $0x58] sm:$0xff]  ;;  %v978_v44 = vld [vmem:[%s2013_s26 + $0x60] sm:$0xff] }
 0x16c   : > { %v877_v30 = vmul.f32 %v1717_v52, %v813_v37  ;;  %v1037_v58 = vmul.f32 %v1717_v52, %v973_v38  ;;  %1726 = vpow2.f32 %v766_v45  ;;  %v768_v62 = vmul.f32 1.442695, %v685_v47  ;;  %v689_v4 = vpop.f32.mrb[14].mxu0  ;;  %v2326_v7 = vpop.f32.mrb[14].mxu1  ;;  %v977_v31 = vld [vmem:[%s2013_s26 + $0x58] sm:$0xff] }
 0x16d   : > { %v1166_v63 = vadd.f32 %v1165_v53, %v876_v55  ;;  %v1238_v0 = vadd.f32 %v1237_v54, %v1036_v56  ;;  %1728 = vpow2.f32 %v786_v42  ;;  %v1719_v8 = vpop.eup %1718  ;;  %v770_v9 = vmul.f32 1.442695, %v689_v4  ;;  %v691_v10 = vpop.f32.mrb[15].mxu0  ;;  %v818_v42 = vld [vmem:[%s2250_s9 + $0x60] sm:$0xff]  ;;  %v828_v55 = vld [vmem:[%s2250_s9 + $0xb0] sm:$0xff]  ;;  %v819_v56 = vld [vmem:[%s2250_s9 + $0x68] sm:$0xff] }
 0x16e   : > { %1730 = vpow2.f32 %v768_v62  ;;  %v2329_v14 = vpop.f32.mrb[15].mxu1  ;;  %v878_v20 = vmul.f32 %v1719_v8, %v814_v60  ;;  %v1038_v21 = vmul.f32 %v1719_v8, %v974_v61  ;;  %v772_v25 = vmul.f32 1.442695, %v691_v10 }
 0x16f   : > { %v1721_v15 = vpop.eup %1720  ;;  %v1167_v16 = vadd.f32 %v1166_v63, %v877_v30  ;;  %v1239_v18 = vadd.f32 %v1238_v0, %v1037_v58  ;;  %1732 = vpow2.f32 %v770_v9  ;;  %v794_v45 = vmul.f32 1.442695, %v2293_v13  ;;  %v979_v30 = vld [vmem:[%s2013_s26 + $0x68] sm:$0xff] }
 0x170   : > { %v879_v22 = vmul.f32 %v1721_v15, %v815_v2  ;;  %v1039_v35 = vmul.f32 %v1721_v15, %v975_v3  ;;  %1734 = vpow2.f32 %v788_v5  ;;  %v796_v58 = vmul.f32 1.442695, %v2299_v19  ;;  %v820_v2 = vld [vmem:[%s2250_s9 + $0x70] sm:$0xff]  ;;  %v829_v15 = vld [vmem:[%s2250_s9 + $0xb8] sm:$0xff] }
 0x171   : > { %v1168_v27 = vadd.f32 %v1167_v16, %v878_v20  ;;  %v1240_v28 = vadd.f32 %v1239_v18, %v1038_v21  ;;  %v1723_v51 = vpop.eup %1722  ;;  %1736 = vpow2.f32 %v772_v25  ;;  %v980_v3 = vld [vmem:[%s2013_s26 + $0x70] sm:$0xff]  ;;  %v798_v5 = vmul.f32 1.442695, %v2314_v43  ;;  %v821_v18 = vld [vmem:[%s2250_s9 + $0x78] sm:$0xff] }
 0x172   : > { %v880_v37 = vmul.f32 %v1723_v51, %v816_v23  ;;  %v1040_v38 = vmul.f32 %v1723_v51, %v976_v24  ;;  %1738 = vpow2.f32 %v790_v11  ;;  %v982_v11 = vld [vmem:[%s2013_s26 + $0x80] sm:$0xff]  ;;  %v981_v20 = vld [vmem:[%s2013_s26 + $0x78] sm:$0xff]  ;;  %v800_v21 = vmul.f32 1.442695, %v2319_v49 }
 0x173   : > { %v1169_v34 = vadd.f32 %v1168_v27, %v879_v22  ;;  %v1241_v36 = vadd.f32 %v1240_v28, %v1039_v35  ;;  %v1725_v39 = vpop.eup %1724  ;;  %1740 = vpow2.f32 %v792_v32  ;;  %v1046_v27 = vmul.f32 %v2262_v41, %v982_v11  ;;  %v830_v51 = vld [vmem:[%s2250_s9 + $0xc0] sm:$0xff] }
 0x174   : > { %v881_v53 = vmul.f32 %v1725_v39, %v817_v29  ;;  %v1041_v54 = vmul.f32 %v1725_v39, %v977_v31  ;;  %1742 = vpow2.f32 %v794_v45  ;;  %v802_v29 = vmul.f32 1.442695, %v2326_v7  ;;  %v831_v39 = vld [vmem:[%s2250_s9 + $0xc8] sm:$0xff] }
 0x175   : > { %v1170_v47 = vadd.f32 %v1169_v34, %v880_v37  ;;  %v1242_v52 = vadd.f32 %v1241_v36, %v1040_v38  ;;  %1744 = vpow2.f32 %v796_v58  ;;  %v983_v36 = vld [vmem:[%s2013_s26 + $0x88] sm:$0xff]  ;;  %v984_v38 = vld [vmem:[%s2013_s26 + $0x90] sm:$0xff]  ;;  %v804_v41 = vmul.f32 1.442695, %v2329_v14  ;;  %v986_v14 = vld [vmem:[%s2013_s26 + $0xa0] sm:$0xff] }
 0x176   : > { %v1727_v59 = vpop.eup %1726  ;;  %1746 = vpow2.f32 %v798_v5  ;;  %v1047_v7 = vmul.f32 %v2266_v46, %v983_v36  ;;  %v833_v58 = vld [vmem:[%s2250_s9 + $0xd8] sm:$0xff] }
 0x177   : > { %v2343_v60 = vpop.eup %1728  ;;  %v1171_v61 = vadd.f32 %v1170_v47, %v881_v53  ;;  %v1243_v62 = vadd.f32 %v1242_v52, %v1041_v54  ;;  %v882_v13 = vmul.f32 %v1727_v59, %v818_v42  ;;  %v1042_v63 = vmul.f32 %v1727_v59, %v978_v44  ;;  %v832_v52 = vld [vmem:[%s2250_s9 + $0xd0] sm:$0xff]  ;;  %v985_v59 = vld [vmem:[%s2013_s26 + $0x98] sm:$0xff] }
 0x178   : > { %v1731_v0 = vpop.eup %1730  ;;  %v2348_v4 = vmul.f32 %v2343_v60, %v828_v55  ;;  %1748 = vpow2.f32 %v800_v21  ;;  %v1048_v55 = vmul.f32 %v2282_v1, %v984_v38 }
 0x179   : > { %v1172_v19 = vadd.f32 %v1171_v61, %v882_v13  ;;  %v1244_v8 = vadd.f32 %v1243_v62, %v1042_v63  ;;  %v883_v9 = vmul.f32 %v1731_v0, %v819_v56  ;;  %v1043_v10 = vmul.f32 %v1731_v0, %v979_v30  ;;  %v1733_v16 = vpop.eup %1732  ;;  %v834_v63 = vld [vmem:[%s2250_s9 + $0xe0] sm:$0xff] }
 0x17a   : > { %v2356_v22 = vpop.eup %1734  ;;  %v884_v43 = vmul.f32 %v1733_v16, %v820_v2  ;;  %v1044_v24 = vmul.f32 %v1733_v16, %v980_v3  ;;  %1750 = vpow2.f32 %v802_v29  ;;  %v1050_v2 = vmul.f32 %v2302_v26, %v986_v14  ;;  %v987_v3 = vld [vmem:[%s2013_s26 + $0xa8] sm:$0xff]  ;;  %v836_v16 = vld [vmem:[%s2250_s9 + $0xf0] sm:$0xff] }
 0x17b   : > { %v1173_v35 = vadd.f32 %v1172_v19, %v883_v9  ;;  %v1245_v23 = vadd.f32 %v1244_v8, %v1043_v10  ;;  %v1737_v25 = vpop.eup %1736  ;;  %v2360_v28 = vmul.f32 %v2356_v22, %v829_v15  ;;  %1752 = vpow2.f32 %v804_v41  ;;  %v988_v8 = vld [vmem:[%s2013_s26 + $0xb0] sm:$0xff]  ;;  %v993_v41 = vld [vmem:[%s2013_s26 + $0xd8] sm:$0xff] }
 0x17c   : > { %v885_v32 = vmul.f32 %v1737_v25, %v821_v18  ;;  %v1045_v34 = vmul.f32 %v1737_v25, %v981_v20  ;;  %v1739_v37 = vpop.eup %1738  ;;  %v1052_v26 = vmul.f32 %v2343_v60, %v988_v8  ;;  %v989_v20 = vld [vmem:[%s2013_s26 + $0xb8] sm:$0xff] }
 0x17d   : > { %v1174_v49 = vadd.f32 %v1173_v35, %v884_v43  ;;  %v1246_v31 = vadd.f32 %v1245_v23, %v1044_v24  ;;  %v894_v45 = vmul.f32 %v1739_v37, %v830_v51  ;;  %v1741_v47 = vpop.eup %1740  ;;  %v990_v23 = vld [vmem:[%s2013_s26 + $0xc0] sm:$0xff]  ;;  %v837_v43 = vld [vmem:[%s2250_s9 + $0xf8] sm:$0xff] }
 0x17e   : > { %v895_v56 = vmul.f32 %v1741_v47, %v831_v39  ;;  %v1743_v30 = vpop.eup %1742  ;;  %v1054_v29 = vmul.f32 %v1739_v37, %v990_v23 }
 0x17f   : > { %v1175_v42 = vadd.f32 %v1174_v49, %v885_v32  ;;  %v1247_v44 = vadd.f32 %v1246_v31, %v1045_v34  ;;  %v896_v62 = vmul.f32 %v1743_v30, %v832_v52  ;;  %v1745_v13 = vpop.eup %1744  ;;  %v991_v49 = vld [vmem:[%s2013_s26 + $0xc8] sm:$0xff]  ;;  %v992_v31 = vld [vmem:[%s2013_s26 + $0xd0] sm:$0xff] }
 0x180   : > { %v897_v5 = vmul.f32 %v1745_v13, %v833_v58  ;;  %v1747_v19 = vpop.eup %1746  ;;  %v1055_v36 = vmul.f32 %v1741_v47, %v991_v49  ;;  %v1056_v38 = vmul.f32 %v1743_v30, %v992_v31  ;;  %v997_v47 = vld [vmem:[%s2013_s26 + $0xf8] sm:$0xff] }
 0x181   : > { %v1176_v53 = vadd.f32 %v1175_v42, %v2271_v50  ;;  %v1248_v54 = vadd.f32 %v1247_v44, %v1046_v27  ;;  %v1049_v50 = vmul.f32 %v2286_v6, %v985_v59  ;;  %v898_v11 = vmul.f32 %v1747_v19, %v834_v63  ;;  %v994_v42 = vld [vmem:[%s2013_s26 + $0xe0] sm:$0xff] }
 0x182   : > { %v1749_v15 = vpop.eup %1748  ;;  %v1051_v6 = vmul.f32 %v2306_v33, %v987_v3  ;;  %v1053_v27 = vmul.f32 %v2356_v22, %v989_v20  ;;  %v1058_v37 = vmul.f32 %v1747_v19, %v994_v42 }
 0x183   : > { %v1177_v61 = vadd.f32 %v1176_v53, %v2276_v57  ;;  %v1249_v46 = vadd.f32 %v1248_v54, %v1047_v7  ;;  %v835_v57 = vld [vmem:[%s2250_s9 + $0xe8] sm:$0xff]  ;;  %v1057_v7 = vmul.f32 %v1745_v13, %v993_v41  ;;  %v996_v54 = vld [vmem:[%s2013_s26 + $0xf0] sm:$0xff] }
 0x184   : > { %v899_v21 = vmul.f32 %v1749_v15, %v835_v57  ;;  %v1751_v35 = vpop.eup %1750  ;;  %v995_v53 = vld [vmem:[%s2013_s26 + $0xe8] sm:$0xff]  ;;  %s1433_s26 = sshll.u32 %s2009_s22, 3 }
 0x185   : > { %v1178_v1 = vadd.f32 %v1177_v61, %v2291_v12  ;;  %v1250_v0 = vadd.f32 %v1249_v46, %v1048_v55  ;;  %v900_v25 = vmul.f32 %v1751_v35, %v836_v16  ;;  %v1753_v33 = vpop.eup %1752  ;;  %v1060_v58 = vmul.f32 %v1751_v35, %v996_v54  ;;  %s293_s24 = scalar_lea.vmem [#allocation7], %s1433_s26 }
 0x186   : > { %v901_v60 = vmul.f32 %v1753_v33, %v837_v43  ;;  %v1273_v16 = vlaneseq  ;;  %s1296_s25 = sshll.u32 %s293_s24, 4  ;;  %s2409_s25 = int_to_ptr.vmem [resolvable:$true] %s1296_s25 }
 0x187   : > { %v1179_v9 = vadd.f32 %v1178_v1, %v2296_v17  ;;  %v1251_v10 = vadd.f32 %v1250_v0, %v1049_v50  ;;  %v1061_v50 = vmul.f32 %v1753_v33, %v997_v47  ;;  %s1784_s27 = scalar_lea.vmem %s2409_s25, 128  ;;  %p1791_p13 = scmp.lt.s32.totalorder %s2409_s25, %s1789_s21 }
 0x188   : > { %p1785_p8 = scmp.ne.s32.totalorder %s2409_s25, %s1784_s27  ;;  %p1792_p2 = scmp.lt.s32.totalorder %s1790_s7, %s1784_s27 }
 0x189   : > { %v1180_v12 = vadd.f32 %v1179_v9, %v2311_v40  ;;  %v1252_v18 = vadd.f32 %v1251_v10, %v1050_v2 }
 0x18a   : > { %p1786_p0 = pnand %p1785_p8, %p2470_p11  ;;  %p1793_p5 = por %p1792_p2, %p1791_p13 }
 0x18b   : > { %v1181_v17 = vadd.f32 %v1180_v12, %v2317_v48  ;;  %v1253_v24 = vadd.f32 %v1252_v18, %v1051_v6  ;;  %v1274_v12 = vand.u32 127, %v1273_v16 }
 0x18c   : > { %p1787_p6 = pneg %p1786_p0 }
 0x18d   : > { %v1182_v40 = vadd.f32 %v1181_v17, %v2348_v4  ;;  %v1254_v51 = vadd.f32 %v1253_v24, %v1052_v26  ;;  %vm1276_vm2 = vcmp.eq.s32.totalorder %v1274_v12, 1  ;;  %vm1275_vm3 = vcmp.eq.s32.totalorder %v1274_v12, 0 }
 0x18e   : > { %p1794_p4 = pnand %p1793_p5, %p1787_p6 }
 0x18f   : > { %v1183_v32 = vadd.f32 %v1182_v40, %v2360_v28  ;;  %v1255_v34 = vadd.f32 %v1254_v51, %v1053_v27  ;;  %v1059_v28 = vmul.f32 %v1749_v15, %v995_v53 }
 0x191   : > { %v1256_v48 = vadd.f32 %v1255_v34, %v1054_v29  ;;  %v1184_v39 = vadd.f32 %v1183_v32, %v894_v45 }
 0x193   : > { %v1185_v22 = vadd.f32 %v1184_v39, %v895_v56  ;;  %v1257_v44 = vadd.f32 %v1256_v48, %v1055_v36 }
 0x195   : > { %v1186_v4 = vadd.f32 %v1185_v22, %v896_v62  ;;  %v1258_v52 = vadd.f32 %v1257_v44, %v1056_v38 }
 0x197   : > { %v1187_v55 = vadd.f32 %v1186_v4, %v897_v5  ;;  %v1259_v59 = vadd.f32 %v1258_v52, %v1057_v7 }
 0x199   : > { %v1188_v14 = vadd.f32 %v1187_v55, %v898_v11  ;;  %v1260_v61 = vadd.f32 %v1259_v59, %v1058_v37 }
 0x19b   : > { %v1189_v30 = vadd.f32 %v1188_v14, %v899_v21  ;;  %v1261_v45 = vadd.f32 %v1260_v61, %v1059_v28 }
 0x19d   : > { %v1190_v46 = vadd.f32 %v1189_v30, %v900_v25  ;;  %v1262_v63 = vadd.f32 %v1261_v45, %v1060_v58 }
 0x19f   : > { %v1191_v56 = vadd.f32 %v1190_v46, %v901_v60  ;;  %v1263_v1 = vadd.f32 %v1262_v63, %v1061_v50 }
 0x1a1   : > { %1192 = vadd.xlane.f32.xlu0 %v1191_v56 }
 0x1a5   : > { %1264 = vadd.xlane.f32.xlu0 %v1263_v1 }
 0x22e   : > { %v1193_v62 = vpop.xlane.xlu0 %1192 }
 0x22f   : > { %v1194_v13 = vrot.slane %v1193_v62, 4 }
 0x231   : > { %v1195_v0 = vadd.f32 %v1194_v13, %v1193_v62 }
 0x232   : > { %v1265_v2 = vpop.xlane.xlu0 %1264 }
 0x233   : > { %v1196_v3 = vrot.slane %v1195_v0, 2  ;;  %v1266_v5 = vrot.slane %v1265_v2, 4 }
 0x235   : > { %v1267_v19 = vadd.f32 %v1266_v5, %v1265_v2  ;;  %v1197_v8 = vadd.f32 %v1196_v3, %v1195_v0 }
 0x237   : > { %v1268_v57 = vrot.slane %v1267_v19, 2  ;;  %v1198_v9 = vrot.slane %v1197_v8, 1 }
 0x239   : > { %v1269_v10 = vadd.f32 %v1268_v57, %v1267_v19  ;;  %v1199_v11 = vadd.f32 %v1198_v9, %v1197_v8 }
 0x23b   : > { %1622 = vpush %v1199_v11  ;;  %v1270_v15 = vrot.slane %v1269_v10, 1 }
 0x23d   : > { %v1271_v6 = vadd.f32 %v1270_v15, %v1269_v10 }
 0x23f   : > { %1624 = vpush %v1271_v6 }
 0x26c   : > { %s1623_s11 = spop %1622 }
 0x26d   : > { %v1279_v26 = vstv %s1623_s11 }
 0x270   : > { %s1625_s12 = spop %1624 }
 0x271   : > { %v1277_v18 = vstv %s1625_s12 }
 0x272   : > { %v1278_v20 = vsel %vm1276_vm2, %v1277_v18, 0.0 }
 0x273   : > { %v1280_v21 = vsel %vm1275_vm3, %v1279_v26, %v1278_v20 }
 0x274   : > { %1281 = vst [vmem:[%s293_s24] sm:$0xff] %v1280_v21 }
 0x275   : > { %1797 = shalt.err (!%p1794_p4)
}
 0x276   : > { %s1798_s22 = scalar_lea.hbm %s2407_s6, 128  ;;  %s1802_s26 = scalar_lea.hbm %s2460_s4, 256 }
 0x277   : > { %p1799_p7 = scmp.ne.s32.totalorder %s2407_s6, %s1798_s22  ;;  %p1803_p1 = scmp.lt.u32.totalorder %s2407_s6, %s2460_s4 }
 0x278   : > { %p1804_p3 = scmp.lt.u32.totalorder %s1802_s26, %s1798_s22  ;;  %p1806_p8 = scmp.lt.u32.totalorder %s1798_s22, %s2407_s6 }
 0x279   : > { %p1800_p10 = pnand %p1799_p7, %p2470_p11 }
 0x27a   : > { %p1805_p9 = por %p1804_p3, %p1803_p1 }
 0x27b   : > { %p1801_p12 = pneg %p1800_p10 }
 0x27c   : > { %p1807_p0 = por %p1806_p8, %p1805_p9 }
 0x27e   : > { %p1808_p6 = pnand %p1807_p0, %p1801_p12 }
 0x280   : > { %1811 = shalt.err (!%p1808_p6)
}
 0x281   : > { %1628 = dma.vmem_to_hbm [thread:$0]  (%p2470_p11), %s2409_s25, 128, %s2407_s6, %s1283_s18  }
 0x282 PF: > { %s1308_s24 = sand.u32 1, %s1846_s15   ;;  %p2471_p13 = scmp.ne.s32.totalorder %s2465_s30, 0 }
 0x283   : > { %p2472_p2 = scmp.ge.s32.totalorder %s1866_s20, 2  ;;  %s1309_s12 = scalar_lea.sflag [#allocation6], %s1308_s24 }
 0x285   : > { %p1635_p5 = pnand %p2472_p2, %p2471_p13 }
 0x287   : > { %1841 = dma.done.wait (!%p1635_p5), %s1309_s12, 128  }
 0x288   : > { %1843 = vsyncadd (!%p1635_p5), %s1309_s12, 4294967168  ;;  %s20_s20 = sadd.s32 1, %s1866_s20   ;;  %s2473_s15 = smov %s1850_s16 }
 0x289   : > { %p17_p4 = scmp.ge.s32.totalorder %s20_s20, 4   ;;  %s2474_s16 = smov %s1854_s17 }
 0x28a   : > { %s2475_s17 = smov %s1953_s29  ;;  %s2476_s18 = smov %s1862_s19 }
 0x28b   : > { %s2477_s19 = smov %s2479_s23  ;;  %19 = sbr.rel (!%p17_p4) target bundleno = 6 (0x6), region = 98 }
 0x292   :  { %1314 = vsyncpa [#allocation5], 1 }
 0x293   :  { %1316 = vsyncpa [#allocation5 + $0x1], 1 }
 0x294   :  { %1317 = vsyncpa [#allocation6], 1 }
 0x295   :  { %1319 = vsyncpa [#allocation6 + $0x1], 1 }

</bundles_post_ra>
